<compile_context>
chip_gen: v5e
topology: v5e:2x2
jax: 0.10.0
libtpu: 0.0.40
codegen_flags: <defaults>
</compile_context>

<pallas_src>
import jax
import jax.numpy as jnp
from jax.experimental import pallas as pl
from jax.experimental.pallas import tpu as pltpu


def mlp_kernel(x_ref, w1_ref, b1_ref, w2_ref, b2_ref, o_ref):
    # fc1: (TM, D) @ (D, H) + (1, H), ReLU on the VPU.
    h = jnp.dot(x_ref[...], w1_ref[...], preferred_element_type=jnp.float32)
    h = jnp.maximum(h + b1_ref[...], 0.0)
    # fc2: (TM, H) @ (H, C) + (1, C), stored narrow (C columns) straight to HBM.
    y = jnp.dot(h, w2_ref[...], preferred_element_type=jnp.float32)
    o_ref[...] = (y + b2_ref[...]).astype(o_ref.dtype)


def classifier_nn_forward(x, w1, b1, w2, b2, *, tm=2048):
    """Forward pass of ClassifierNN.

    x : (B, D) float32
    w1: (D, H) float32   (transpose of torch fc1.weight)
    b1: (1, H) float32
    w2: (H, C) float32   (transpose of torch fc2.weight)
    b2: (1, C) float32
    returns (B, C) float32 logits
    """
    B, D = x.shape
    H = w1.shape[1]
    C = w2.shape[1]

    # Batch tile: multiple of 8 sublanes, no larger than needed for small B.
    tm = min(tm, ((B + 7) // 8) * 8)
    grid = (pl.cdiv(B, tm),)   # ragged trailing tile handled by Pallas

    cost = pl.CostEstimate(
        flops=2 * B * (D * H + H * C),
        transcendentals=0,
        bytes_accessed=4 * (B * D + D * H + H + H * C + C + B * C),
    )

    out = pl.pallas_call(
        mlp_kernel,
        out_shape=jax.ShapeDtypeStruct((B, C), jnp.float32),
        grid_spec=pl.GridSpec(
            grid=grid,
            in_specs=[
                pl.BlockSpec((tm, D), lambda i: (i, 0)),   # x tile: pipelined per step
                pl.BlockSpec((D, H), lambda i: (0, 0)),    # weights: VMEM-resident
                pl.BlockSpec((1, H), lambda i: (0, 0)),
                pl.BlockSpec((H, C), lambda i: (0, 0)),
                pl.BlockSpec((1, C), lambda i: (0, 0)),
            ],
            out_specs=pl.BlockSpec((tm, C), lambda i: (i, 0)),  # narrow logits
        ),
        compiler_params=pltpu.CompilerParams(
            dimension_semantics=("parallel",),
            vmem_limit_bytes=32 * 1024 * 1024,
        ),
        cost_estimate=cost,
    )(x, w1, b1, w2, b2)

    return out


def reference_forward(x, w1, b1, w2, b2):
    h = jnp.maximum(x @ w1 + b1, 0.0)
    return h @ w2 + b2


if __name__ == "__main__":
    # Small shapes consistent with the module: batch=8, input_dim=32,
    # hidden=128 (fixed by the module), num_classes=10.
    B, D, H, C = 8, 32, 128, 10

    key = jax.random.PRNGKey(0)
    kx, kw1, kb1, kw2, kb2 = jax.random.split(key, 5)

    x = jax.random.normal(kx, (B, D), dtype=jnp.float32)

    # Deterministic parameter init (uniform, mimicking nn.Linear's scale).
    bound1 = 1.0 / (D ** 0.5)
    w1 = jax.random.uniform(kw1, (D, H), minval=-bound1, maxval=bound1,
                            dtype=jnp.float32)
    b1 = jax.random.uniform(kb1, (1, H), minval=-bound1, maxval=bound1,
                            dtype=jnp.float32)
    bound2 = 1.0 / (H ** 0.5)
    w2 = jax.random.uniform(kw2, (H, C), minval=-bound2, maxval=bound2,
                            dtype=jnp.float32)
    b2 = jax.random.uniform(kb2, (1, C), minval=-bound2, maxval=bound2,
                            dtype=jnp.float32)

    out = classifier_nn_forward(x, w1, b1, w2, b2)
    out = jax.block_until_ready(out)

    ref = reference_forward(x, w1, b1, w2, b2)
    assert out.shape == (B, C)
    assert jnp.allclose(out, ref, atol=1e-4, rtol=1e-4)

    print("KERNEL_OK")
</pallas_src>

<mosaic_0001>
module attributes {stable_mosaic.version = 11 : i64} {
  func.func @mlp_kernel(%arg0: i32, %arg1: memref<8x32xf32, #tpu.memory_space<vmem>>, %arg2: memref<32x128xf32, #tpu.memory_space<vmem>>, %arg3: memref<1x128xf32, #tpu.memory_space<vmem>>, %arg4: memref<128x10xf32, #tpu.memory_space<vmem>>, %arg5: memref<1x10xf32, #tpu.memory_space<vmem>>, %arg6: memref<8x10xf32, #tpu.memory_space<vmem>>) attributes {dimension_semantics = [#tpu.dimension_semantics<parallel>], iteration_bounds = array<i64: 1>, scalar_prefetch = 0 : i64, scratch_operands = 0 : i64, tpu.core_type = #tpu.core_type<tc>, window_params = [{transform_indices = @transform_0, window_bounds = array<i64: 8, 32>}, {pipeline_mode = #tpu.pipeline_mode<synchronous>, transform_indices = @transform_1, window_bounds = array<i64: 32, 128>}, {pipeline_mode = #tpu.pipeline_mode<synchronous>, transform_indices = @transform_2, window_bounds = array<i64: 1, 128>}, {pipeline_mode = #tpu.pipeline_mode<synchronous>, transform_indices = @transform_3, window_bounds = array<i64: 128, 10>}, {pipeline_mode = #tpu.pipeline_mode<synchronous>, transform_indices = @transform_4, window_bounds = array<i64: 1, 10>}, {transform_indices = @transform_5, window_bounds = array<i64: 8, 10>}]} {
    %c0 = arith.constant 0 : index
    %c0_0 = arith.constant 0 : index
    %0 = vector.load %arg1[%c0, %c0_0] : memref<8x32xf32, #tpu.memory_space<vmem>>, vector<8x32xf32>
    %c0_1 = arith.constant 0 : index
    %c0_2 = arith.constant 0 : index
    %1 = vector.load %arg2[%c0_1, %c0_2] : memref<32x128xf32, #tpu.memory_space<vmem>>, vector<32x128xf32>
    %cst = arith.constant dense<0.000000e+00> : vector<8x128xf32>
    %2 = tpu.matmul %0, %1, %cst {dimension_numbers = #tpu.dot_dimension_numbers<[1], [0], [0], [1], [0, 0, 1, 1], [], []>} : vector<8x32xf32>, vector<32x128xf32>, vector<8x128xf32> -> vector<8x128xf32>
    %c0_3 = arith.constant 0 : index
    %c0_4 = arith.constant 0 : index
    %3 = vector.load %arg3[%c0_3, %c0_4] : memref<1x128xf32, #tpu.memory_space<vmem>>, vector<1x128xf32>
    %4 = vector.broadcast %3 : vector<1x128xf32> to vector<8x128xf32>
    %5 = arith.addf %2, %4 : vector<8x128xf32>
    %cst_5 = arith.constant 0.000000e+00 : f32
    %6 = vector.broadcast %cst_5 : f32 to vector<8x128xf32>
    %7 = arith.maximumf %5, %6 : vector<8x128xf32>
    %c0_6 = arith.constant 0 : index
    %c0_7 = arith.constant 0 : index
    %8 = vector.load %arg4[%c0_6, %c0_7] : memref<128x10xf32, #tpu.memory_space<vmem>>, vector<128x10xf32>
    %cst_8 = arith.constant dense<0.000000e+00> : vector<8x10xf32>
    %9 = tpu.matmul %7, %8, %cst_8 {dimension_numbers = #tpu.dot_dimension_numbers<[1], [0], [0], [1], [0, 0, 1, 1], [], []>} : vector<8x128xf32>, vector<128x10xf32>, vector<8x10xf32> -> vector<8x10xf32>
    %c0_9 = arith.constant 0 : index
    %c0_10 = arith.constant 0 : index
    %10 = vector.load %arg5[%c0_9, %c0_10] : memref<1x10xf32, #tpu.memory_space<vmem>>, vector<1x10xf32>
    %11 = vector.broadcast %10 : vector<1x10xf32> to vector<8x10xf32>
    %12 = arith.addf %9, %11 : vector<8x10xf32>
    %c0_11 = arith.constant 0 : index
    %c0_12 = arith.constant 0 : index
    %13 = vector.load %arg6[%c0_11, %c0_12] : memref<8x10xf32, #tpu.memory_space<vmem>>, vector<8x10xf32>
    tpu.vector_store %arg6[%c0_11, %c0_12], %12 {strides = array<i32>} : memref<8x10xf32, #tpu.memory_space<vmem>>, vector<8x10xf32>,
    return
  }
  func.func @transform_0(%arg0: i32) -> (i32, i32) {
    %c0_i32 = arith.constant 0 : i32
    %c0_i32_0 = arith.constant 0 : i32
    return %arg0, %c0_i32 : i32, i32
  }
  func.func @transform_1(%arg0: i32) -> (i32, i32) {
    %c0_i32 = arith.constant 0 : i32
    %c0_i32_0 = arith.constant 0 : i32
    %c0_i32_1 = arith.constant 0 : i32
    return %c0_i32, %c0_i32_0 : i32, i32
  }
  func.func @transform_2(%arg0: i32) -> (i32, i32) {
    %c0_i32 = arith.constant 0 : i32
    %c0_i32_0 = arith.constant 0 : i32
    %c0_i32_1 = arith.constant 0 : i32
    return %c0_i32, %c0_i32_0 : i32, i32
  }
  func.func @transform_3(%arg0: i32) -> (i32, i32) {
    %c0_i32 = arith.constant 0 : i32
    %c0_i32_0 = arith.constant 0 : i32
    %c0_i32_1 = arith.constant 0 : i32
    return %c0_i32, %c0_i32_0 : i32, i32
  }
  func.func @transform_4(%arg0: i32) -> (i32, i32) {
    %c0_i32 = arith.constant 0 : i32
    %c0_i32_0 = arith.constant 0 : i32
    %c0_i32_1 = arith.constant 0 : i32
    return %c0_i32, %c0_i32_0 : i32, i32
  }
  func.func @transform_5(%arg0: i32) -> (i32, i32) {
    %c0_i32 = arith.constant 0 : i32
    %c0_i32_0 = arith.constant 0 : i32
    return %arg0, %c0_i32 : i32, i32
  }
}

</mosaic_0001>

<bundles_post_ra>
// kernel: tpu_custom_call.1
= control target key start
LH: loop header
LB: loop body
LE: loop exit
PB: predicated region body
PF: predicated region fallthrough
CT: control target
= control target key end

     0   :  { %vm30_vm0 = vcmask 261120   ;;  %s246_s0 = inlined_call_operand.vmem [shape: f32[8,32], index: 0, kind: input, shape index: {}]   ;;  %s247_s1 = inlined_call_operand.vmem [shape: f32[32,128], index: 1, kind: input, shape index: {}]   ;;  %s248_s2 = inlined_call_operand.vmem [shape: f32[1,128], index: 2, kind: input, shape index: {}]   ;;  %s249_s3 = inlined_call_operand.vmem [shape: f32[128,10], index: 3, kind: input, shape index: {}]   ;;  %s250_s4 = inlined_call_operand.vmem [shape: f32[1,10], index: 4, kind: input, shape index: {}]   ;;  %s251_s5 = inlined_call_operand.hbm [shape: f32[8,10], index: 5, kind: output, shape index: {}]  }
   0x1   :  { %v25_v0 = vld [vmem:[%s247_s1 + $0x18] sm:$0xff]  ;;  %v24_v1 = vld [vmem:[%s247_s1 + $0x10] sm:$0xff]  ;;  %v23_v3 = vld [vmem:[%s247_s1 + $0x8] sm:$0xff] }
   0x2   :  { %46 = vmatpush.msra.mxu0 %v25_v0  ;;  %v70_v2 = vld [vmem:[%s249_s3 + $0x78] sm:$0xff]  ;;  %v69_v4 = vld [vmem:[%s249_s3 + $0x70] sm:$0xff]  ;;  %v68_v5 = vld [vmem:[%s249_s3 + $0x68] sm:$0xff] }
   0x3   :  { %75 = vmatpush.msra.mxu1 %v70_v2  ;;  %v22_v6 = vld [vmem:[%s247_s1] sm:$0xff]  ;;  %v66_v9 = vld [vmem:[%s249_s3 + $0x58] sm:$0xff] }
   0x4   :  { %47 = vmatpush.msra.mxu0 %v24_v1  ;;  %v21_v7 = vld [vmem:[%s246_s0] sm:$0xff] }
   0x5   :  { %76 = vmatpush.msra.mxu1 %v69_v4  ;;  %v67_v8 = vld [vmem:[%s249_s3 + $0x60] sm:$0xff] }
   0x6   :  { %48 = vmatpush.msra.mxu0 %v23_v3 }
   0x7   :  { %77 = vmatpush.msra.mxu1 %v68_v5 }
   0x8   :  { %49 = vmatpush.msra.mxu0 %v22_v6 }
   0x9   :  { %10 = vsyncpa [#allocation3], 0  ;;  %113 = vmatmul.msk.f32.vlgmr.msra.gmra.mxu0 %vm30_vm0, %v21_v7  ;;  %78 = vmatpush.msra.mxu1 %v67_v8  ;;  %v65_v10 = vld [vmem:[%s249_s3 + $0x50] sm:$0xff]  ;;  %v64_v11 = vld [vmem:[%s249_s3 + $0x48] sm:$0xff]  ;;  %s143_s12 = smov [#allocation2]   ;;  %s104_s14 = sshll.u32 %s251_s5, 4  ;;  %s105_s14 = int_to_ptr.hbm [resolvable:$true] %s104_s14 }
   0xa   :  { %v63_v12 = vld [vmem:[%s249_s3 + $0x40] sm:$0xff]  ;;  %v62_v13 = vld [vmem:[%s249_s3 + $0x38] sm:$0xff]  ;;  %v61_v14 = vld [vmem:[%s249_s3 + $0x30] sm:$0xff]  ;;  %s102_s1 = sshll.u32 %s143_s12, 4  ;;  %vm95_vm1 = vcmask 80896   ;;  %s103_s1 = int_to_ptr.vmem [resolvable:$true] %s102_s1 }
   0xb   :  { %79 = vmatpush.msra.mxu1 %v66_v9  ;;  %v60_v15 = vld [vmem:[%s249_s3 + $0x28] sm:$0xff]  ;;  %v59_v16 = vld [vmem:[%s249_s3 + $0x20] sm:$0xff]  ;;  %v58_v17 = vld [vmem:[%s249_s3 + $0x18] sm:$0xff] }
   0xc   :  { %v57_v18 = vld [vmem:[%s249_s3 + $0x10] sm:$0xff]  ;;  %v56_v19 = vld [vmem:[%s249_s3 + $0x8] sm:$0xff]  ;;  %v55_v20 = vld [vmem:[%s249_s3] sm:$0xff] }
   0xd   :  { %80 = vmatpush.msra.mxu1 %v65_v10  ;;  %v115_v21 = vld [vmem:[%s248_s2] ss:$0 sm:$0xff] }
   0xe   :  { %v116_v25 = vld [vmem:[%s250_s4] ss:$0 sm:$0xff] }
   0xf   :  { %81 = vmatpush.msra.mxu1 %v64_v11 }
  0x11   :  { %82 = vmatpush.msra.mxu1 %v63_v12 }
  0x13   :  { %83 = vmatpush.msra.mxu1 %v62_v13 }
  0x15   :  { %84 = vmatpush.msra.mxu1 %v61_v14 }
  0x17   :  { %85 = vmatpush.msra.mxu1 %v60_v15 }
  0x19   :  { %86 = vmatpush.msra.mxu1 %v59_v16 }
  0x1b   :  { %87 = vmatpush.msra.mxu1 %v58_v17 }
  0x1d   :  { %88 = vmatpush.msra.mxu1 %v57_v18 }
  0x1f   :  { %89 = vmatpush.msra.mxu1 %v56_v19 }
  0x21   :  { %90 = vmatpush.msra.mxu1 %v55_v20 }
  0x86   :  { %v51_v22 = vpop.f32.mrf.mxu0 }
  0x87   :  { %v52_v23 = vadd.f32 %v115_v21, %v51_v22 }
  0x89   :  { %v54_v24 = vmax.f32 %v52_v23, 0.0 }
  0x8b   :  { %91 = vmatmul.f32.vlgmr.msra.gmra.mxu1 %v54_v24 }
 0x108   :  { %v92_v26 = vpop.f32.mrf.mxu1 }
 0x109   :  { %v93_v27 = vadd.f32 %v116_v25, %v92_v26 }
 0x10b   :  { %96 = vst.msk [vmem:[#allocation2] sm:$0xff] %vm95_vm1, %v93_v27 }
 0x10c   :  { %107 = dma.vmem_to_hbm [thread:$0]  %s103_s1, 128, %s105_s14, [#allocation3]  }
 0x10d   :  { %141 = dma.done.wait [#allocation3], 128  }
 0x10e   :  { %142 = vsyncadd [#allocation3], 4294967168 }
 0x10f   :  { %112 = vsyncpa [#allocation3], 1 }

</bundles_post_ra>
